<compile_context>
chip_gen: v5e
topology: v5e:2x2
jax: 0.10.0
libtpu: 0.0.40
codegen_flags: <defaults>
</compile_context>

<pallas_src>
import functools

import jax
import jax.numpy as jnp
from jax.experimental import pallas as pl
from jax.experimental.pallas import tpu as pltpu


# --------------------------------- kernel ------------------------------------


def _fused_block_kernel(x_ref, wpre_ref, bpre_ref, w33_ref, b33_ref,
                        wpost_ref, bpost_ref, o_ref, pad_ref, *, H, W, cdt):
    """Fused bottleneck block for ONE image per grid step.

    x_ref   : (1, Cin, H*W)    channels-first view of the NCHW input
    wpre    : (Cmid, Cin)      folded conv_pre weight, transposed   (compute dtype)
    bpre    : (Cmid, 1)        folded conv_pre bias                 (f32)
    w33     : (9, Cmid, Cmid)  folded 3x3 weight, one (Cmid,Cmid) slab per tap (compute dtype)
    b33     : (1, Cmid)        folded 3x3 bias                      (f32)
    wpost   : (Cout, Cmid)     folded conv_post weight, transposed  (compute dtype)
    bpost   : (Cout, 1)        folded conv_post bias                (f32)
    o_ref   : (1, Cout, H*W)   channels-first output slab
    pad_ref : (H+2, W+2, Cmid) VMEM scratch for the 3x3 halo        (compute dtype)
    """
    HW = H * W
    cmid = wpre_ref.shape[0]

    # Zero only the halo BORDER of the scratch (the interior is fully overwritten below).
    # Done every grid step so it stays correct under megacore sharding of the parallel axis.
    zrow = jnp.zeros((1, W + 2, cmid), dtype=pad_ref.dtype)
    zcol = jnp.zeros((H + 2, 1, cmid), dtype=pad_ref.dtype)
    pad_ref[0:1, :, :] = zrow
    pad_ref[H + 1:H + 2, :, :] = zrow
    pad_ref[:, 0:1, :] = zcol
    pad_ref[:, W + 1:W + 2, :] = zcol

    x_cf = x_ref[0]                                    # (Cin, H*W), channels-first
    x_mm = x_cf.astype(cdt)

    # --- conv_pre (1x1) + BN + ReLU, channels-first (no transpose of the big input) -------
    y = jax.lax.dot_general(wpre_ref[...], x_mm,
                            dimension_numbers=(((1,), (0,)), ((), ())),
                            preferred_element_type=jnp.float32)        # (Cmid, H*W) f32
    y = jnp.maximum(y + bpre_ref[...], 0.0)
    # Only the Cin/Cmid-times-smaller activation is re-laid out channels-last, in compute
    # dtype, into the zero-bordered halo scratch.
    y_hwc = y.astype(cdt).T                                            # (H*W, Cmid)
    pad_ref[1:H + 1, 1:W + 1, :] = y_hwc.reshape(H, W, cmid)

    # --- conv33 (3x3, stride 1, pad 1) + BN + ReLU -----------------------------------------
    # Nine accumulating (HW, Cmid) @ (Cmid, Cmid) matmuls into one f32 accumulator:
    # no im2col patch materialization, no 9-way lane concat.
    acc = jnp.zeros((HW, cmid), jnp.float32)
    taps = [(dh, dw) for dh in range(3) for dw in range(3)]
    for t, (dh, dw) in enumerate(taps):
        tap = pad_ref[dh:dh + H, dw:dw + W, :].reshape(HW, cmid)       # compute dtype
        acc = acc + jnp.dot(tap, w33_ref[t], preferred_element_type=jnp.float32)
    z = jnp.maximum(acc + b33_ref[...], 0.0)                           # (H*W, Cmid) f32

    # --- conv_post (1x1) + BN, fused residual add + final ReLU -----------------------------
    # NT matmul emits the result channels-first, so the store is NCHW-native and the residual
    # is the exact x tile already sitting in VMEM (downsample=None path). Epilogue in f32.
    out = jax.lax.dot_general(wpost_ref[...], z.astype(cdt),
                              dimension_numbers=(((1,), (1,)), ((), ())),
                              preferred_element_type=jnp.float32)      # (Cout, H*W)
    out = out + bpost_ref[...] + x_cf.astype(jnp.float32)
    o_ref[0] = jnp.maximum(out, 0.0).astype(o_ref.dtype)


# --------------------------- Block forward (Pallas) ---------------------------

_EPS = 1e-5


def _fold_bn(w, conv_bias, bn):
    """Fold inference BatchNorm into conv weight (last axis = Cout) and bias."""
    gamma, beta, mean, var = bn
    scale = gamma / jnp.sqrt(var + _EPS)
    return w * scale, (conv_bias - mean) * scale + beta


def block_forward(x_nchw, params, *, num_layers=50, compute_dtype=jnp.bfloat16):
    assert num_layers > 34, "only the bottleneck (num_layers>34) path is implemented"
    N, Cin, H, W = x_nchw.shape
    HW = H * W

    # Fold inference BN into conv weights/biases (done once, outside the kernel).
    w_pre, b_pre = _fold_bn(params["w_pre"], params["b_pre"], params["bn_pre"])
    w33, b33 = _fold_bn(params["w33"], params["b33"], params["bn33"])
    w_post, b_post = _fold_bn(params["w_post"], params["b_post"], params["bn_post"])

    cmid = w_pre.shape[1]
    cout = w_post.shape[1]
    assert cout == Cin, "downsample=None requires in_channels == out_channels*expansion"

    cdt = jnp.dtype(compute_dtype)
    wpre_t = w_pre.T.astype(cdt)                              # (Cmid, Cin)
    w33f = w33.reshape(9, cmid, cmid).astype(cdt)             # (9, Cmid, Cmid), tap-major
    wpost_t = w_post.T.astype(cdt)                            # (Cout, Cmid)
    bpre = b_pre.reshape(cmid, 1).astype(jnp.float32)
    b33r = b33.reshape(1, cmid).astype(jnp.float32)
    bpost = b_post.reshape(cout, 1).astype(jnp.float32)

    x2 = x_nchw.reshape(N, Cin, HW)     # free view: NCHW row-major == (N, C, H*W)

    kernel = functools.partial(_fused_block_kernel, H=H, W=W, cdt=cdt)

    out = pl.pallas_call(
        kernel,
        out_shape=jax.ShapeDtypeStruct((N, cout, HW), x_nchw.dtype),
        grid_spec=pltpu.PrefetchScalarGridSpec(
            num_scalar_prefetch=0,
            grid=(N,),                                           # one image per grid step
            in_specs=[
                pl.BlockSpec((1, Cin, HW), lambda i: (i, 0, 0)),     # x (NCHW view)
                pl.BlockSpec((cmid, Cin), lambda i: (0, 0)),         # w_pre (T)
                pl.BlockSpec((cmid, 1), lambda i: (0, 0)),           # b_pre
                pl.BlockSpec((9, cmid, cmid), lambda i: (0, 0, 0)),  # w33 (per-tap slabs)
                pl.BlockSpec((1, cmid), lambda i: (0, 0)),           # b33
                pl.BlockSpec((cout, cmid), lambda i: (0, 0)),        # w_post (T)
                pl.BlockSpec((cout, 1), lambda i: (0, 0)),           # b_post
            ],
            out_specs=pl.BlockSpec((1, cout, HW), lambda i: (i, 0, 0)),
            scratch_shapes=[pltpu.VMEM((H + 2, W + 2, cmid), cdt)],
        ),
        compiler_params=pltpu.CompilerParams(
            dimension_semantics=("parallel",),
            vmem_limit_bytes=48 * 1024 * 1024,   # within v7x's 64 MiB, ample on v5e/v6e
        ),
    )(x2, wpre_t, bpre, w33f, b33r, wpost_t, bpost)

    return out.reshape(N, cout, H, W)    # free view back to NCHW


# --------------------------- pure-JAX reference -------------------------------


def _bn_apply(y, bn):
    gamma, beta, mean, var = bn
    return gamma * (y - mean) / jnp.sqrt(var + _EPS) + beta


def ref_block_forward(x_nchw, params):
    x = jnp.transpose(x_nchw, (0, 2, 3, 1))
    identity = x
    y = jnp.einsum("nhwc,co->nhwo", x, params["w_pre"]) + params["b_pre"]
    y = jnp.maximum(_bn_apply(y, params["bn_pre"]), 0.0)
    H, W = y.shape[1], y.shape[2]
    yp = jnp.pad(y, ((0, 0), (1, 1), (1, 1), (0, 0)))
    z = jnp.zeros(y.shape[:3] + (params["w33"].shape[-1],), jnp.float32)
    for dh in range(3):
        for dw in range(3):
            z = z + jnp.einsum("nhwc,co->nhwo",
                               yp[:, dh:dh + H, dw:dw + W, :], params["w33"][dh, dw])
    z = z + params["b33"]
    z = jnp.maximum(_bn_apply(z, params["bn33"]), 0.0)
    o = jnp.einsum("nhwc,co->nhwo", z, params["w_post"]) + params["b_post"]
    o = _bn_apply(o, params["bn_post"])
    o = jnp.maximum(o + identity, 0.0)
    return jnp.transpose(o, (0, 3, 1, 2))


# ------------------------------ param init ------------------------------------


def init_params(key, in_channels, out_channels, expansion):
    ks = jax.random.split(key, 9)

    def conv_w(k, shape, fan_in):
        return jax.random.normal(k, shape, jnp.float32) / jnp.sqrt(float(fan_in))

    def bn_params(k, c):
        k1, k2, k3, k4 = jax.random.split(k, 4)
        gamma = 1.0 + 0.1 * jax.random.normal(k1, (c,), jnp.float32)
        beta = 0.1 * jax.random.normal(k2, (c,), jnp.float32)
        mean = 0.1 * jax.random.normal(k3, (c,), jnp.float32)
        var = jnp.abs(jax.random.normal(k4, (c,), jnp.float32)) + 0.5
        return gamma, beta, mean, var

    c_exp = out_channels * expansion
    return {
        "w_pre": conv_w(ks[0], (in_channels, out_channels), in_channels),
        "b_pre": 0.01 * jax.random.normal(ks[1], (out_channels,), jnp.float32),
        "bn_pre": bn_params(ks[2], out_channels),
        "w33": conv_w(ks[3], (3, 3, out_channels, out_channels), 9 * out_channels),
        "b33": 0.01 * jax.random.normal(ks[4], (out_channels,), jnp.float32),
        "bn33": bn_params(ks[5], out_channels),
        "w_post": conv_w(ks[6], (out_channels, c_exp), out_channels),
        "b_post": 0.01 * jax.random.normal(ks[7], (c_exp,), jnp.float32),
        "bn_post": bn_params(ks[8], c_exp),
    }


# ---------------------------------- main ---------------------------------------

if __name__ == "__main__":
    num_layers = 50          # bottleneck block -> expansion = 4
    in_channels = 16
    out_channels = 4         # out_channels * 4 == in_channels so downsample=None works
    N, H, W = 2, 8, 8

    key = jax.random.PRNGKey(0)
    kx, kp = jax.random.split(key)
    x = jax.random.normal(kx, (N, in_channels, H, W), jnp.float32)   # NCHW, like PyTorch
    params = init_params(kp, in_channels, out_channels, expansion=4)

    ref = jax.block_until_ready(ref_block_forward(x, params))

    # Exact-precision path (f32 MXU inputs): tight numerical check.
    out_f32 = jax.block_until_ready(
        block_forward(x, params, num_layers=num_layers, compute_dtype=jnp.float32))
    assert out_f32.shape == (N, out_channels * 4, H, W), out_f32.shape
    assert jnp.allclose(out_f32, ref, rtol=1e-4, atol=1e-4), \
        float(jnp.abs(out_f32 - ref).max())

    # Performance path (bf16 MXU inputs, f32 accumulation): loosened tolerance.
    out_bf16 = jax.block_until_ready(
        block_forward(x, params, num_layers=num_layers, compute_dtype=jnp.bfloat16))
    assert out_bf16.shape == (N, out_channels * 4, H, W), out_bf16.shape
    assert jnp.allclose(out_bf16, ref, rtol=1e-1, atol=1e-1), \
        float(jnp.abs(out_bf16 - ref).max())

    print("KERNEL_OK")
</pallas_src>

<mosaic_0001>
module attributes {stable_mosaic.version = 11 : i64} {
  func.func @_fused_block_kernel(%arg0: i32, %arg1: memref<1x16x64xf32, #tpu.memory_space<vmem>>, %arg2: memref<4x16xf32, #tpu.memory_space<vmem>>, %arg3: memref<4x1xf32, #tpu.memory_space<vmem>>, %arg4: memref<9x4x4xf32, #tpu.memory_space<vmem>>, %arg5: memref<1x4xf32, #tpu.memory_space<vmem>>, %arg6: memref<16x4xf32, #tpu.memory_space<vmem>>, %arg7: memref<16x1xf32, #tpu.memory_space<vmem>>, %arg8: memref<1x16x64xf32, #tpu.memory_space<vmem>>, %arg9: memref<10x10x4xf32, #tpu.memory_space<vmem>>) attributes {dimension_semantics = [#tpu.dimension_semantics<parallel>], iteration_bounds = array<i64: 2>, scalar_prefetch = 0 : i64, scratch_operands = 1 : i64, tpu.core_type = #tpu.core_type<tc>, window_params = [{transform_indices = @transform_0, window_bounds = array<i64: 1, 16, 64>}, {pipeline_mode = #tpu.pipeline_mode<synchronous>, transform_indices = @transform_1, window_bounds = array<i64: 4, 16>}, {pipeline_mode = #tpu.pipeline_mode<synchronous>, transform_indices = @transform_2, window_bounds = array<i64: 4, 1>}, {pipeline_mode = #tpu.pipeline_mode<synchronous>, transform_indices = @transform_3, window_bounds = array<i64: 9, 4, 4>}, {pipeline_mode = #tpu.pipeline_mode<synchronous>, transform_indices = @transform_4, window_bounds = array<i64: 1, 4>}, {pipeline_mode = #tpu.pipeline_mode<synchronous>, transform_indices = @transform_5, window_bounds = array<i64: 16, 4>}, {pipeline_mode = #tpu.pipeline_mode<synchronous>, transform_indices = @transform_6, window_bounds = array<i64: 16, 1>}, {transform_indices = @transform_7, window_bounds = array<i64: 1, 16, 64>}]} {
    %cst = arith.constant 0.000000e+00 : f32
    %0 = vector.broadcast %cst : f32 to vector<1x10x4xf32>
    %cst_0 = arith.constant 0.000000e+00 : f32
    %1 = vector.broadcast %cst_0 : f32 to vector<10x1x4xf32>
    %c0 = arith.constant 0 : index
    %c0_1 = arith.constant 0 : index
    %c0_2 = arith.constant 0 : index
    %2 = vector.load %arg9[%c0, %c0_1, %c0_2] : memref<10x10x4xf32, #tpu.memory_space<vmem>>, vector<1x10x4xf32>
    tpu.vector_store %arg9[%c0, %c0_1, %c0_2], %0 {strides = array<i32>} : memref<10x10x4xf32, #tpu.memory_space<vmem>>, vector<1x10x4xf32>,
    %c9 = arith.constant 9 : index
    %c0_3 = arith.constant 0 : index
    %c0_4 = arith.constant 0 : index
    %3 = vector.load %arg9[%c9, %c0_3, %c0_4] : memref<10x10x4xf32, #tpu.memory_space<vmem>>, vector<1x10x4xf32>
    tpu.vector_store %arg9[%c9, %c0_3, %c0_4], %0 {strides = array<i32>} : memref<10x10x4xf32, #tpu.memory_space<vmem>>, vector<1x10x4xf32>,
    %c0_5 = arith.constant 0 : index
    %c0_6 = arith.constant 0 : index
    %c0_7 = arith.constant 0 : index
    %4 = vector.load %arg9[%c0_5, %c0_6, %c0_7] : memref<10x10x4xf32, #tpu.memory_space<vmem>>, vector<10x1x4xf32>
    tpu.vector_store %arg9[%c0_5, %c0_6, %c0_7], %1 {strides = array<i32>} : memref<10x10x4xf32, #tpu.memory_space<vmem>>, vector<10x1x4xf32>,
    %c0_8 = arith.constant 0 : index
    %c9_9 = arith.constant 9 : index
    %c0_10 = arith.constant 0 : index
    %5 = vector.load %arg9[%c0_8, %c9_9, %c0_10] : memref<10x10x4xf32, #tpu.memory_space<vmem>>, vector<10x1x4xf32>
    tpu.vector_store %arg9[%c0_8, %c9_9, %c0_10], %1 {strides = array<i32>} : memref<10x10x4xf32, #tpu.memory_space<vmem>>, vector<10x1x4xf32>,
    %c0_11 = arith.constant 0 : index
    %c0_12 = arith.constant 0 : index
    %c0_13 = arith.constant 0 : index
    %6 = vector.load %arg1[%c0_11, %c0_12, %c0_13] : memref<1x16x64xf32, #tpu.memory_space<vmem>>, vector<1x16x64xf32>
    %7 = vector.shape_cast %6 : vector<1x16x64xf32> to vector<16x64xf32>
    %c0_14 = arith.constant 0 : index
    %c0_15 = arith.constant 0 : index
    %8 = vector.load %arg2[%c0_14, %c0_15] : memref<4x16xf32, #tpu.memory_space<vmem>>, vector<4x16xf32>
    %cst_16 = arith.constant dense<0.000000e+00> : vector<4x64xf32>
    %9 = tpu.matmul %8, %7, %cst_16 {dimension_numbers = #tpu.dot_dimension_numbers<[1], [0], [0], [1], [0, 0, 1, 1], [], []>} : vector<4x16xf32>, vector<16x64xf32>, vector<4x64xf32> -> vector<4x64xf32>
    %c0_17 = arith.constant 0 : index
    %c0_18 = arith.constant 0 : index
    %10 = vector.load %arg3[%c0_17, %c0_18] : memref<4x1xf32, #tpu.memory_space<vmem>>, vector<4x1xf32>
    %11 = vector.broadcast %10 : vector<4x1xf32> to vector<4x64xf32>
    %12 = arith.addf %9, %11 : vector<4x64xf32>
    %cst_19 = arith.constant 0.000000e+00 : f32
    %13 = vector.broadcast %cst_19 : f32 to vector<4x64xf32>
    %14 = arith.maximumf %12, %13 : vector<4x64xf32>
    %15 = tpu.transpose %14, [1, 0] : vector<4x64xf32> -> vector<64x4xf32>
    %16 = vector.shape_cast %15 : vector<64x4xf32> to vector<8x8x4xf32>
    %c1 = arith.constant 1 : index
    %c1_20 = arith.constant 1 : index
    %c0_21 = arith.constant 0 : index
    %17 = vector.load %arg9[%c1, %c1_20, %c0_21] : memref<10x10x4xf32, #tpu.memory_space<vmem>>, vector<8x8x4xf32>
    tpu.vector_store %arg9[%c1, %c1_20, %c0_21], %16 {strides = array<i32>} : memref<10x10x4xf32, #tpu.memory_space<vmem>>, vector<8x8x4xf32>,
    %cst_22 = arith.constant 0.000000e+00 : f32
    %18 = vector.broadcast %cst_22 : f32 to vector<64x4xf32>
    %c0_23 = arith.constant 0 : index
    %c0_24 = arith.constant 0 : index
    %c0_25 = arith.constant 0 : index
    %19 = vector.load %arg9[%c0_23, %c0_24, %c0_25] : memref<10x10x4xf32, #tpu.memory_space<vmem>>, vector<8x8x4xf32>
    %20 = vector.shape_cast %19 : vector<8x8x4xf32> to vector<64x4xf32>
    %c0_26 = arith.constant 0 : index
    %c0_27 = arith.constant 0 : index
    %c0_28 = arith.constant 0 : index
    %21 = vector.load %arg4[%c0_26, %c0_27, %c0_28] : memref<9x4x4xf32, #tpu.memory_space<vmem>>, vector<1x4x4xf32>
    %22 = vector.shape_cast %21 : vector<1x4x4xf32> to vector<4x4xf32>
    %cst_29 = arith.constant dense<0.000000e+00> : vector<64x4xf32>
    %23 = tpu.matmul %20, %22, %cst_29 {dimension_numbers = #tpu.dot_dimension_numbers<[1], [0], [0], [1], [0, 0, 1, 1], [], []>} : vector<64x4xf32>, vector<4x4xf32>, vector<64x4xf32> -> vector<64x4xf32>
    %24 = arith.addf %18, %23 : vector<64x4xf32>
    %c0_30 = arith.constant 0 : index
    %c1_31 = arith.constant 1 : index
    %c0_32 = arith.constant 0 : index
    %25 = vector.load %arg9[%c0_30, %c1_31, %c0_32] : memref<10x10x4xf32, #tpu.memory_space<vmem>>, vector<8x8x4xf32>
    %26 = vector.shape_cast %25 : vector<8x8x4xf32> to vector<64x4xf32>
    %c1_33 = arith.constant 1 : index
    %c0_34 = arith.constant 0 : index
    %c0_35 = arith.constant 0 : index
    %27 = vector.load %arg4[%c1_33, %c0_34, %c0_35] : memref<9x4x4xf32, #tpu.memory_space<vmem>>, vector<1x4x4xf32>
    %28 = vector.shape_cast %27 : vector<1x4x4xf32> to vector<4x4xf32>
    %cst_36 = arith.constant dense<0.000000e+00> : vector<64x4xf32>
    %29 = tpu.matmul %26, %28, %cst_36 {dimension_numbers = #tpu.dot_dimension_numbers<[1], [0], [0], [1], [0, 0, 1, 1], [], []>} : vector<64x4xf32>, vector<4x4xf32>, vector<64x4xf32> -> vector<64x4xf32>
    %30 = arith.addf %24, %29 : vector<64x4xf32>
    %c0_37 = arith.constant 0 : index
    %c2 = arith.constant 2 : index
    %c0_38 = arith.constant 0 : index
    %31 = vector.load %arg9[%c0_37, %c2, %c0_38] : memref<10x10x4xf32, #tpu.memory_space<vmem>>, vector<8x8x4xf32>
    %32 = vector.shape_cast %31 : vector<8x8x4xf32> to vector<64x4xf32>
    %c2_39 = arith.constant 2 : index
    %c0_40 = arith.constant 0 : index
    %c0_41 = arith.constant 0 : index
    %33 = vector.load %arg4[%c2_39, %c0_40, %c0_41] : memref<9x4x4xf32, #tpu.memory_space<vmem>>, vector<1x4x4xf32>
    %34 = vector.shape_cast %33 : vector<1x4x4xf32> to vector<4x4xf32>
    %cst_42 = arith.constant dense<0.000000e+00> : vector<64x4xf32>
    %35 = tpu.matmul %32, %34, %cst_42 {dimension_numbers = #tpu.dot_dimension_numbers<[1], [0], [0], [1], [0, 0, 1, 1], [], []>} : vector<64x4xf32>, vector<4x4xf32>, vector<64x4xf32> -> vector<64x4xf32>
    %36 = arith.addf %30, %35 : vector<64x4xf32>
    %c1_43 = arith.constant 1 : index
    %c0_44 = arith.constant 0 : index
    %c0_45 = arith.constant 0 : index
    %37 = vector.load %arg9[%c1_43, %c0_44, %c0_45] : memref<10x10x4xf32, #tpu.memory_space<vmem>>, vector<8x8x4xf32>
    %38 = vector.shape_cast %37 : vector<8x8x4xf32> to vector<64x4xf32>
    %c3 = arith.constant 3 : index
    %c0_46 = arith.constant 0 : index
    %c0_47 = arith.constant 0 : index
    %39 = vector.load %arg4[%c3, %c0_46, %c0_47] : memref<9x4x4xf32, #tpu.memory_space<vmem>>, vector<1x4x4xf32>
    %40 = vector.shape_cast %39 : vector<1x4x4xf32> to vector<4x4xf32>
    %cst_48 = arith.constant dense<0.000000e+00> : vector<64x4xf32>
    %41 = tpu.matmul %38, %40, %cst_48 {dimension_numbers = #tpu.dot_dimension_numbers<[1], [0], [0], [1], [0, 0, 1, 1], [], []>} : vector<64x4xf32>, vector<4x4xf32>, vector<64x4xf32> -> vector<64x4xf32>
    %42 = arith.addf %36, %41 : vector<64x4xf32>
    %c1_49 = arith.constant 1 : index
    %c1_50 = arith.constant 1 : index
    %c0_51 = arith.constant 0 : index
    %43 = vector.load %arg9[%c1_49, %c1_50, %c0_51] : memref<10x10x4xf32, #tpu.memory_space<vmem>>, vector<8x8x4xf32>
    %44 = vector.shape_cast %43 : vector<8x8x4xf32> to vector<64x4xf32>
    %c4 = arith.constant 4 : index
    %c0_52 = arith.constant 0 : index
    %c0_53 = arith.constant 0 : index
    %45 = vector.load %arg4[%c4, %c0_52, %c0_53] : memref<9x4x4xf32, #tpu.memory_space<vmem>>, vector<1x4x4xf32>
    %46 = vector.shape_cast %45 : vector<1x4x4xf32> to vector<4x4xf32>
    %cst_54 = arith.constant dense<0.000000e+00> : vector<64x4xf32>
    %47 = tpu.matmul %44, %46, %cst_54 {dimension_numbers = #tpu.dot_dimension_numbers<[1], [0], [0], [1], [0, 0, 1, 1], [], []>} : vector<64x4xf32>, vector<4x4xf32>, vector<64x4xf32> -> vector<64x4xf32>
    %48 = arith.addf %42, %47 : vector<64x4xf32>
    %c1_55 = arith.constant 1 : index
    %c2_56 = arith.constant 2 : index
    %c0_57 = arith.constant 0 : index
    %49 = vector.load %arg9[%c1_55, %c2_56, %c0_57] : memref<10x10x4xf32, #tpu.memory_space<vmem>>, vector<8x8x4xf32>
    %50 = vector.shape_cast %49 : vector<8x8x4xf32> to vector<64x4xf32>
    %c5 = arith.constant 5 : index
    %c0_58 = arith.constant 0 : index
    %c0_59 = arith.constant 0 : index
    %51 = vector.load %arg4[%c5, %c0_58, %c0_59] : memref<9x4x4xf32, #tpu.memory_space<vmem>>, vector<1x4x4xf32>
    %52 = vector.shape_cast %51 : vector<1x4x4xf32> to vector<4x4xf32>
    %cst_60 = arith.constant dense<0.000000e+00> : vector<64x4xf32>
    %53 = tpu.matmul %50, %52, %cst_60 {dimension_numbers = #tpu.dot_dimension_numbers<[1], [0], [0], [1], [0, 0, 1, 1], [], []>} : vector<64x4xf32>, vector<4x4xf32>, vector<64x4xf32> -> vector<64x4xf32>
    %54 = arith.addf %48, %53 : vector<64x4xf32>
    %c2_61 = arith.constant 2 : index
    %c0_62 = arith.constant 0 : index
    %c0_63 = arith.constant 0 : index
    %55 = vector.load %arg9[%c2_61, %c0_62, %c0_63] : memref<10x10x4xf32, #tpu.memory_space<vmem>>, vector<8x8x4xf32>
    %56 = vector.shape_cast %55 : vector<8x8x4xf32> to vector<64x4xf32>
    %c6 = arith.constant 6 : index
    %c0_64 = arith.constant 0 : index
    %c0_65 = arith.constant 0 : index
    %57 = vector.load %arg4[%c6, %c0_64, %c0_65] : memref<9x4x4xf32, #tpu.memory_space<vmem>>, vector<1x4x4xf32>
    %58 = vector.shape_cast %57 : vector<1x4x4xf32> to vector<4x4xf32>
    %cst_66 = arith.constant dense<0.000000e+00> : vector<64x4xf32>
    %59 = tpu.matmul %56, %58, %cst_66 {dimension_numbers = #tpu.dot_dimension_numbers<[1], [0], [0], [1], [0, 0, 1, 1], [], []>} : vector<64x4xf32>, vector<4x4xf32>, vector<64x4xf32> -> vector<64x4xf32>
    %60 = arith.addf %54, %59 : vector<64x4xf32>
    %c2_67 = arith.constant 2 : index
    %c1_68 = arith.constant 1 : index
    %c0_69 = arith.constant 0 : index
    %61 = vector.load %arg9[%c2_67, %c1_68, %c0_69] : memref<10x10x4xf32, #tpu.memory_space<vmem>>, vector<8x8x4xf32>
    %62 = vector.shape_cast %61 : vector<8x8x4xf32> to vector<64x4xf32>
    %c7 = arith.constant 7 : index
    %c0_70 = arith.constant 0 : index
    %c0_71 = arith.constant 0 : index
    %63 = vector.load %arg4[%c7, %c0_70, %c0_71] : memref<9x4x4xf32, #tpu.memory_space<vmem>>, vector<1x4x4xf32>
    %64 = vector.shape_cast %63 : vector<1x4x4xf32> to vector<4x4xf32>
    %cst_72 = arith.constant dense<0.000000e+00> : vector<64x4xf32>
    %65 = tpu.matmul %62, %64, %cst_72 {dimension_numbers = #tpu.dot_dimension_numbers<[1], [0], [0], [1], [0, 0, 1, 1], [], []>} : vector<64x4xf32>, vector<4x4xf32>, vector<64x4xf32> -> vector<64x4xf32>
    %66 = arith.addf %60, %65 : vector<64x4xf32>
    %c2_73 = arith.constant 2 : index
    %c2_74 = arith.constant 2 : index
    %c0_75 = arith.constant 0 : index
    %67 = vector.load %arg9[%c2_73, %c2_74, %c0_75] : memref<10x10x4xf32, #tpu.memory_space<vmem>>, vector<8x8x4xf32>
    %68 = vector.shape_cast %67 : vector<8x8x4xf32> to vector<64x4xf32>
    %c8 = arith.constant 8 : index
    %c0_76 = arith.constant 0 : index
    %c0_77 = arith.constant 0 : index
    %69 = vector.load %arg4[%c8, %c0_76, %c0_77] : memref<9x4x4xf32, #tpu.memory_space<vmem>>, vector<1x4x4xf32>
    %70 = vector.shape_cast %69 : vector<1x4x4xf32> to vector<4x4xf32>
    %cst_78 = arith.constant dense<0.000000e+00> : vector<64x4xf32>
    %71 = tpu.matmul %68, %70, %cst_78 {dimension_numbers = #tpu.dot_dimension_numbers<[1], [0], [0], [1], [0, 0, 1, 1], [], []>} : vector<64x4xf32>, vector<4x4xf32>, vector<64x4xf32> -> vector<64x4xf32>
    %72 = arith.addf %66, %71 : vector<64x4xf32>
    %c0_79 = arith.constant 0 : index
    %c0_80 = arith.constant 0 : index
    %73 = vector.load %arg5[%c0_79, %c0_80] : memref<1x4xf32, #tpu.memory_space<vmem>>, vector<1x4xf32>
    %74 = vector.broadcast %73 : vector<1x4xf32> to vector<64x4xf32>
    %75 = arith.addf %72, %74 : vector<64x4xf32>
    %cst_81 = arith.constant 0.000000e+00 : f32
    %76 = vector.broadcast %cst_81 : f32 to vector<64x4xf32>
    %77 = arith.maximumf %75, %76 : vector<64x4xf32>
    %c0_82 = arith.constant 0 : index
    %c0_83 = arith.constant 0 : index
    %78 = vector.load %arg6[%c0_82, %c0_83] : memref<16x4xf32, #tpu.memory_space<vmem>>, vector<16x4xf32>
    %cst_84 = arith.constant dense<0.000000e+00> : vector<16x64xf32>
    %79 = tpu.matmul %78, %77, %cst_84 {dimension_numbers = #tpu.dot_dimension_numbers<[1], [1], [0], [0], [0, 0, 1, 0], [], []>} : vector<16x4xf32>, vector<64x4xf32>, vector<16x64xf32> -> vector<16x64xf32>
    %c0_85 = arith.constant 0 : index
    %c0_86 = arith.constant 0 : index
    %80 = vector.load %arg7[%c0_85, %c0_86] : memref<16x1xf32, #tpu.memory_space<vmem>>, vector<16x1xf32>
    %81 = vector.broadcast %80 : vector<16x1xf32> to vector<16x64xf32>
    %82 = arith.addf %79, %81 : vector<16x64xf32>
    %83 = arith.addf %82, %7 : vector<16x64xf32>
    %cst_87 = arith.constant 0.000000e+00 : f32
    %84 = vector.broadcast %cst_87 : f32 to vector<16x64xf32>
    %85 = arith.maximumf %83, %84 : vector<16x64xf32>
    %c0_88 = arith.constant 0 : index
    %c0_89 = arith.constant 0 : index
    %c0_90 = arith.constant 0 : index
    %86 = vector.load %arg8[%c0_88, %c0_89, %c0_90] : memref<1x16x64xf32, #tpu.memory_space<vmem>>, vector<1x16x64xf32>
    %87 = vector.shape_cast %86 : vector<1x16x64xf32> to vector<16x64xf32>
    %88 = vector.shape_cast %85 : vector<16x64xf32> to vector<1x16x64xf32>
    tpu.vector_store %arg8[%c0_88, %c0_89, %c0_90], %88 {strides = array<i32>} : memref<1x16x64xf32, #tpu.memory_space<vmem>>, vector<1x16x64xf32>,
    return
  }
  func.func @transform_0(%arg0: i32) -> (i32, i32, i32) {
    %c0_i32 = arith.constant 0 : i32
    %c0_i32_0 = arith.constant 0 : i32
    %c0_i32_1 = arith.constant 0 : i32
    return %arg0, %c0_i32, %c0_i32_0 : i32, i32, i32
  }
  func.func @transform_1(%arg0: i32) -> (i32, i32) {
    %c0_i32 = arith.constant 0 : i32
    %c0_i32_0 = arith.constant 0 : i32
    %c0_i32_1 = arith.constant 0 : i32
    return %c0_i32, %c0_i32_0 : i32, i32
  }
  func.func @transform_2(%arg0: i32) -> (i32, i32) {
    %c0_i32 = arith.constant 0 : i32
    %c0_i32_0 = arith.constant 0 : i32
    %c0_i32_1 = arith.constant 0 : i32
    return %c0_i32, %c0_i32_0 : i32, i32
  }
  func.func @transform_3(%arg0: i32) -> (i32, i32, i32) {
    %c0_i32 = arith.constant 0 : i32
    %c0_i32_0 = arith.constant 0 : i32
    %c0_i32_1 = arith.constant 0 : i32
    %c0_i32_2 = arith.constant 0 : i32
    return %c0_i32, %c0_i32_0, %c0_i32_1 : i32, i32, i32
  }
  func.func @transform_4(%arg0: i32) -> (i32, i32) {
    %c0_i32 = arith.constant 0 : i32
    %c0_i32_0 = arith.constant 0 : i32
    %c0_i32_1 = arith.constant 0 : i32
    return %c0_i32, %c0_i32_0 : i32, i32
  }
  func.func @transform_5(%arg0: i32) -> (i32, i32) {
    %c0_i32 = arith.constant 0 : i32
    %c0_i32_0 = arith.constant 0 : i32
    %c0_i32_1 = arith.constant 0 : i32
    return %c0_i32, %c0_i32_0 : i32, i32
  }
  func.func @transform_6(%arg0: i32) -> (i32, i32) {
    %c0_i32 = arith.constant 0 : i32
    %c0_i32_0 = arith.constant 0 : i32
    %c0_i32_1 = arith.constant 0 : i32
    return %c0_i32, %c0_i32_0 : i32, i32
  }
  func.func @transform_7(%arg0: i32) -> (i32, i32, i32) {
    %c0_i32 = arith.constant 0 : i32
    %c0_i32_0 = arith.constant 0 : i32
    %c0_i32_1 = arith.constant 0 : i32
    return %arg0, %c0_i32, %c0_i32_0 : i32, i32, i32
  }
}

</mosaic_0001>

<bundles_post_ra>
// kernel: tpu_custom_call.1
= control target key start
LH: loop header
LB: loop body
LE: loop exit
PB: predicated region body
PF: predicated region fallthrough
CT: control target
= control target key end

     0   :  { %12 = vsyncpa [#allocation4], 0  ;;  %s1907_s0 = inlined_call_operand.vmem [shape: f32[2,16,64], index: 0, kind: input, shape index: {}]   ;;  %s1908_s1 = inlined_call_operand.vmem [shape: f32[4,16], index: 1, kind: input, shape index: {}]   ;;  %s1909_s2 = inlined_call_operand.vmem [shape: f32[4,1], index: 2, kind: input, shape index: {}]   ;;  %s1910_s3 = inlined_call_operand.vmem [shape: f32[9,4,4], index: 3, kind: input, shape index: {}]   ;;  %s1911_s4 = inlined_call_operand.vmem [shape: f32[1,4], index: 4, kind: input, shape index: {}]   ;;  %s1912_s5 = inlined_call_operand.vmem [shape: f32[16,4], index: 5, kind: input, shape index: {}]   ;;  %s1913_s6 = inlined_call_operand.vmem [shape: f32[16,1], index: 6, kind: input, shape index: {}]   ;;  %s1914_s7 = inlined_call_operand.hbm [shape: f32[2,16,64], index: 7, kind: output, shape index: {}]  }
   0x1   :  { %14 = vsyncpa [#allocation4 + $0x1], 0  ;;  %s1582_s24 = smov 0   ;;  %s1584_s25 = smov 0  }
   0x2   :  { %s1586_s26 = smov 0   ;;  %s1588_s27 = smov 0  }
   0x3 LB: > { %s1603_s28 = sadd.s32 4294967295, %s1536_s27   ;;  %s1311_s29 = sadd.s32 4294967294, %s1536_s27   ;;  %s1536_s27 = sphi %s1588_s27, %s1920_s27   ;;  %s1532_s26 = sphi %s1586_s26, %s1919_s26   ;;  %s1528_s25 = sphi %s1584_s25, %s1918_s25   ;;  %s1524_s24 = sphi %s1582_s24, %s1917_s24  }
   0x4   : > { %s1607_s30 = sadd.s32 1, %s1536_s27   ;;  %s179_s8 = sadd.s32 1, %s1532_s26 }
   0x5   : > { %s176_s9 = ssub.s32 %s1536_s27, %s1607_s30  ;;  %p189_p0 = scmp.ne.s32.totalorder %s1532_s26, %s1528_s25 }
   0x6   : > { %p177_p1 = scmp.eq.s32.totalorder %s176_s9, 0  ;;  %p190_p2 = scmp.eq.s32.totalorder %s1603_s28, 1 }
   0x7   : > { %p195_p3 = scmp.ne.s32.totalorder %s1528_s25, %s1524_s24  ;;  %p196_p4 = scmp.eq.s32.totalorder %s1311_s29, 1 }
   0x8   : > { %s1618_s10 = scalar_select %p177_p1, %s1532_s26, %s179_s8  }
   0x9   : > { %p1620_p5 = por %p190_p2, %p189_p0  ;;  %p1624_p6 = por %p196_p4, %p195_p3 }
   0xa   : > { %p1314_p7 = scmp.ge.s32.totalorder %s1536_s27, 1  ;;  %p240_p8 = scmp.lt.s32.totalorder %s1536_s27, 3 }
   0xc   : > { %p241_p9 = pnand %p1314_p7, %p240_p8 }
   0xd   : > { %p272_p10 = scmp.lt.s32.totalorder (!%p241_p9), %s1603_s28, 1  ;;  %s269_s22 = sand.u32 (!%p241_p9), 1, %s1528_s25  }
   0xe   : > { %244 = sbr.rel (%p241_p9) target bundleno = 829 (0x33d), region = 48  ;;  %s1315_s23 = sshll.u32 (!%p241_p9), %s269_s22, 4 }
   0xf   : > { %s1424_s29 = sshll.u32 (!%p241_p9), %s1603_s28, 4  ;;  %s271_s14 = scalar_lea.vmem (!%p241_p9), [#allocation3], %s1315_s23 }
  0x10   : > { %s1245_s13 = scalar_lea.hbm (!%p241_p9), %s1914_s7, %s1424_s29  ;;  %s1494_s21 = scalar_lea.hbm (!%p241_p9), %s1914_s7, 32 }
  0x13   : > { %v1538_v0 = vmov 0   ;;  %v308_v1 = vld [vmem:[%s1909_s2] sm:$0xf]  ;;  %s273_s15 = scalar_select %p272_p10, %s1603_s28, 1  ;;  %vm314_vm0 = vcmask 130048   ;;  %vm423_vm1 = vcmask 1043456  }
  0x14   : > { %1471 = vset.pattern.permute.xlu0 %v1538_v0  ;;  %1472 = vset.pattern.permute.xlu1 %v1538_v0  ;;  %v307_v4 = vld [vmem:[%s1908_s1] sm:$0xf]  ;;  %v1319_v5 = vld [vmem:[%s1910_s3 + $0x4] sm:$0xf]  ;;  %vm277_vm2 = vcmask 31744   ;;  %vm279_vm3 = vcmask 25600  }
  0x15   : > { %311 = vperm.xlu0 %1471, %v308_v1   ;;  %s1423_s16 = sshll.u32 %s273_s15, 4  ;;  %1425 = vmatpush.msk.msra.mxu1 %vm423_vm1, %v1319_v5  ;;  %v1539_v10 = vmov 0.0   ;;  %vm284_vm4 = vcmask 24576   ;;  %v1348_v12 = vld [vmem:[%s1910_s3 + $0xc] sm:$0xf]  ;;  %vm1230_vm5 = vcmask 523264  }
  0x16   : > { %s276_s19 = scalar_lea.vmem %s1907_s0, %s1423_s16  ;;  %1426 = vmatpush.msk.msra.mxu2 %vm423_vm1, %v1319_v5  ;;  %1427 = vmatpush.msk.msra.mxu3 %vm423_vm1, %v1319_v5  ;;  %278 = vst.msk [vmem:[#allocation2] sm:$0xff] %vm277_vm2, %v1539_v10  ;;  %v1358_v13 = vld [vmem:[%s1910_s3 + $0x10] sm:$0xf]  ;;  %v388_v15 = vld [vmem:[%s1910_s3] sm:$0xf]  ;;  %s1246_s15 = sshll.u32 %s271_s14, 4  ;;  %s1247_s15 = int_to_ptr.vmem [resolvable:$true] %s1246_s15 }
  0x17   : > { %v1638_v2 = vld [vmem:[%s276_s19 + $0x8] sm:$0xff]  ;;  %v1640_v3 = vld [vmem:[%s276_s19] sm:$0xff]  ;;  %280 = vst.msk [vmem:[#allocation2 + $0x8] sm:$0x3] %vm279_vm3, %v1539_v10  ;;  %1359 = vmatpush.msk.msrb.mxu1 %vm423_vm1, %v1358_v13  ;;  %v1388_v29 = vld [vmem:[%s1910_s3 + $0x1c] sm:$0xf] }
  0x18   : > { %332 = vmatpush.msra.mxu0 %v1638_v2  ;;  %282 = vst.msk [vmem:[#allocation2 + $0x90] sm:$0xff] %vm277_vm2, %v1539_v10  ;;  %1329 = vmatpush.msk.msrb.mxu2 %vm423_vm1, %v388_v15  ;;  %v1338_v25 = vld [vmem:[%s1910_s3 + $0x8] sm:$0xf]  ;;  %v1368_v40 = vld [vmem:[%s1910_s3 + $0x14] sm:$0xf]  ;;  %s1248_s16 = sshll.u32 %s1245_s13, 4  ;;  %s1249_s16 = int_to_ptr.hbm [resolvable:$true] %s1248_s16 }
  0x19   : > { %283 = vst.msk [vmem:[#allocation2 + $0x98] sm:$0x3] %vm279_vm3, %v1539_v10  ;;  %1339 = vmatpush.msk.msrb.mxu3 %vm423_vm1, %v1338_v25  ;;  %v1398_v41 = vld [vmem:[%s1910_s3 + $0x20] sm:$0xf]  ;;  %v1378_v44 = vld [vmem:[%s1910_s3 + $0x18] sm:$0xf] }
  0x1a   : > { %333 = vmatpush.msra.mxu0 %v1640_v3  ;;  %286 = vst.msk [vmem:[#allocation2 + $0x10] sm:$0x1] %vm284_vm4, %v1539_v10  ;;  %s1234_s28 = scalar_lea.sflag [#allocation4], %s269_s22  ;;  %s1488_s17 = sshra.s32 %s1249_s16, 4  ;;  %s1489_s17 = int_to_ptr.hbm [resolvable:$true] %s1488_s17 }
  0x1b   : > { %1318 = vmatmul.msk.f32.vlgmr.msra.gmra.mxu0 %vm314_vm0, %v307_v4  ;;  %285 = vst.msk [vmem:[#allocation2] sm:$0x1] %vm284_vm4, %v1539_v10  ;;  %s1490_s18 = scalar_lea.hbm %s1489_s17, 16  ;;  %p1495_p0 = scmp.lt.s32.totalorder %s1489_s17, %s1914_s7 }
  0x1c   : > { %1320 = vmatpush.msk.msrb.mxu0 %vm423_vm1, %v1319_v5  ;;  %287 = vst.msk [vmem:[#allocation2 + $0x20] sm:$0x1] %vm284_vm4, %v1539_v10  ;;  %p1491_p11 = scmp.ne.s32.totalorder %s1489_s17, %s1490_s18  ;;  %p1496_p1 = scmp.lt.s32.totalorder %s1494_s21, %s1490_s18 }
  0x1d   : > { %288 = vst.msk [vmem:[#allocation2 + $0x30] sm:$0x1] %vm284_vm4, %v1539_v10 }
  0x1e   : > { %v389_v11 = vld [vmem:[#allocation2 + $0x1] sm:$0xff]  ;;  %1349 = vmatpush.msk.msra.mxu0 %vm423_vm1, %v1348_v12  ;;  %289 = vst.msk [vmem:[#allocation2 + $0x40] sm:$0x1] %vm284_vm4, %v1539_v10  ;;  %p1492_p12 = pnand %p1491_p11, %p1620_p5  ;;  %p1497_p2 = por %p1496_p1, %p1495_p0 }
  0x1f   : > { %290 = vst.msk [vmem:[#allocation2 + $0x50] sm:$0x1] %vm284_vm4, %v1539_v10 }
  0x20   : > { %291 = vst.msk [vmem:[#allocation2 + $0x60] sm:$0x1] %vm284_vm4, %v1539_v10  ;;  %v974_v58 = vld [vmem:[#allocation2 + $0x91] sm:$0xff]  ;;  %p1493_p13 = pneg %p1492_p12 }
  0x21   : > { %292 = vst.msk [vmem:[#allocation2 + $0x70] sm:$0x1] %vm284_vm4, %v1539_v10 }
  0x22   : > { %293 = vst.msk [vmem:[#allocation2 + $0x80] sm:$0x1] %vm284_vm4, %v1539_v10  ;;  %v380_v30 = vld [vmem:[#allocation2] sm:$0xff]  ;;  %p1498_p3 = pnand %p1497_p2, %p1493_p13 }
  0x23   : > { %1321 = vmatmul.msk.f32.vlgmr.msrb.gmra.mxu0 %vm277_vm2, %v389_v11  ;;  %294 = vst.msk [vmem:[#allocation2 + $0x90] sm:$0x1] %vm284_vm4, %v1539_v10 }
  0x24   : > { %295 = vst.msk [vmem:[#allocation2 + $0x9] sm:$0x1] %vm284_vm4, %v1539_v10  ;;  %1389 = vmatpush.msk.msrb.mxu0 %vm423_vm1, %v1388_v29 }
  0x25   : > { %296 = vst.msk [vmem:[#allocation2 + $0x19] sm:$0x1] %vm284_vm4, %v1539_v10 }
  0x26   : > { %297 = vst.msk [vmem:[#allocation2 + $0x29] sm:$0x1] %vm284_vm4, %v1539_v10 }
  0x27   : > { %298 = vst.msk [vmem:[#allocation2 + $0x39] sm:$0x1] %vm284_vm4, %v1539_v10 }
  0x28   : > { %299 = vst.msk [vmem:[#allocation2 + $0x49] sm:$0x1] %vm284_vm4, %v1539_v10 }
  0x29   : > { %300 = vst.msk [vmem:[#allocation2 + $0x59] sm:$0x1] %vm284_vm4, %v1539_v10 }
  0x2a   : > { %301 = vst.msk [vmem:[#allocation2 + $0x69] sm:$0x1] %vm284_vm4, %v1539_v10 }
  0x2b   : > { %302 = vst.msk [vmem:[#allocation2 + $0x79] sm:$0x1] %vm284_vm4, %v1539_v10  ;;  %v536_v42 = vld [vmem:[#allocation2 + $0x2] sm:$0xff] }
  0x2c   : > { %303 = vst.msk [vmem:[#allocation2 + $0x89] sm:$0x1] %vm284_vm4, %v1539_v10 }
  0x2d   : > { %304 = vst.msk [vmem:[#allocation2 + $0x99] sm:$0x1] %vm284_vm4, %v1539_v10 }
  0x34   : > { %v1060_v59 = vld [vmem:[#allocation2 + $0x92] sm:$0xff] }
  0x87   : > { %v312_v6 = vpop.permute.xlu0 %311 }
  0x98   : > { %v335_v7 = vpop.f32.mrf.mxu0 }
  0x99   : > { %v336_v8 = vadd.f32 %v335_v7, %v312_v6 }
  0x9b   : > { %v338_v9 = vmax.f32 %v336_v8, 0.0 }
  0x9d   : > { %339 = vxpose.xlu0.b32.start.end [1/1] (short) (narrow) %v338_v9, 64  ;;  %v888_v9 = vld [vmem:[#allocation2 + $0x90] sm:$0xff] }
  0xa0   : > { %v444_v56 = vpop.f32.mrf.mxu0 }
 0x141   : > { %v355_v14 = vpop.trf.xlu0 }
 0x142   : > { %372 = vst.msk [vmem:[#allocation2 + $0x11] sm:$0xff] %vm277_vm2, %v355_v14 }
 0x149   : > { %v356_v16 = vpop.trf.xlu0  ;;  %v390_v17 = vld [vmem:[#allocation2 + $0x11] sm:$0xff] }
 0x14a   : > { %v622_v18 = vld [vmem:[#allocation2 + $0x10] sm:$0xff]  ;;  %373 = vst.msk [vmem:[#allocation2 + $0x21] sm:$0xff] %vm277_vm2, %v356_v16  ;;  %1322 = vmatmul.msk.f32.vlgmr.msra.gmra.mxu1 %vm277_vm2, %v390_v17 }
 0x14b   : > { %1350 = vmatmul.msk.f32.vlgmr.msra.gmra.mxu0 %vm277_vm2, %v622_v18  ;;  %1399 = vmatpush.msk.msra.mxu1 %vm423_vm1, %v1398_v41  ;;  %v537_v45 = vld [vmem:[#allocation2 + $0x12] sm:$0xff] }
 0x151   : > { %v357_v19 = vpop.trf.xlu0  ;;  %v1693_v20 = vld [vmem:[#allocation2 + $0x21] sm:$0xff] }
 0x152   : > { %v1695_v21 = vld [vmem:[#allocation2 + $0x20] sm:$0xff]  ;;  %374 = vst.msk [vmem:[#allocation2 + $0x31] sm:$0xff] %vm277_vm2, %v357_v19  ;;  %1323 = vmatmul.msk.f32.gmra.mxu1 %vm277_vm2, %v1693_v20 }
 0x153   : > { %1351 = vmatmul.msk.f32.gmra.mxu0 %vm277_vm2, %v1695_v21  ;;  %v538_v46 = vld [vmem:[#allocation2 + $0x22] sm:$0xff] }
 0x159   : > { %v358_v22 = vpop.trf.xlu0  ;;  %v392_v23 = vld [vmem:[#allocation2 + $0x31] sm:$0xff] }
 0x15a   : > { %v1702_v24 = vld [vmem:[#allocation2 + $0x30] sm:$0xff]  ;;  %375 = vst.msk [vmem:[#allocation2 + $0x41] sm:$0xff] %vm277_vm2, %v358_v22  ;;  %1324 = vmatmul.msk.f32.gmra.mxu1 %vm277_vm2, %v392_v23 }
 0x15b   : > { %1352 = vmatmul.msk.f32.gmra.mxu0 %vm277_vm2, %v1702_v24  ;;  %v539_v48 = vld [vmem:[#allocation2 + $0x32] sm:$0xff] }
 0x161   : > { %v359_v26 = vpop.trf.xlu0  ;;  %v393_v27 = vld [vmem:[#allocation2 + $0x41] sm:$0xff] }
 0x162   : > { %v1712_v28 = vld [vmem:[#allocation2 + $0x40] sm:$0xff]  ;;  %376 = vst.msk [vmem:[#allocation2 + $0x51] sm:$0xff] %vm277_vm2, %v359_v26  ;;  %1325 = vmatmul.msk.f32.vlgmr.msra.gmra.mxu2 %vm277_vm2, %v393_v27  ;;  %1360 = vmatmul.msk.f32.vlgmr.msrb.gmra.mxu1 %vm277_vm2, %v390_v17 }
 0x163   : > { %1353 = vmatmul.msk.f32.gmra.mxu0 %vm277_vm2, %v1712_v28  ;;  %1369 = vmatpush.msk.msra.mxu2 %vm423_vm1, %v1368_v40  ;;  %v540_v49 = vld [vmem:[#allocation2 + $0x42] sm:$0xff] }
 0x169   : > { %v360_v31 = vpop.trf.xlu0  ;;  %v394_v32 = vld [vmem:[#allocation2 + $0x51] sm:$0xff] }
 0x16a   : > { %v1723_v33 = vld [vmem:[#allocation2 + $0x50] sm:$0xff]  ;;  %377 = vst.msk [vmem:[#allocation2 + $0x61] sm:$0xff] %vm277_vm2, %v360_v31  ;;  %1326 = vmatmul.msk.f32.vlgmr.msra.gmra.mxu3 %vm277_vm2, %v394_v32  ;;  %1330 = vmatmul.msk.f32.vlgmr.msrb.gmra.mxu2 %vm277_vm2, %v380_v30 }
 0x16b   : > { %1354 = vmatmul.msk.f32.gmra.mxu0 %vm277_vm2, %v1723_v33  ;;  %1361 = vmatmul.msk.f32.gmra.mxu1 %vm277_vm2, %v1693_v20  ;;  %v541_v50 = vld [vmem:[#allocation2 + $0x52] sm:$0xff] }
 0x16c   : > { %1379 = vmatpush.msk.msra.mxu3 %vm423_vm1, %v1378_v44 }
 0x171   : > { %v361_v34 = vpop.trf.xlu0  ;;  %v395_v35 = vld [vmem:[#allocation2 + $0x61] sm:$0xff] }
 0x172   : > { %v1732_v36 = vld [vmem:[#allocation2 + $0x60] sm:$0xff]  ;;  %378 = vst.msk [vmem:[#allocation2 + $0x71] sm:$0xff] %vm277_vm2, %v361_v34  ;;  %1327 = vmatmul.msk.f32.gmra.mxu3 %vm277_vm2, %v395_v35  ;;  %1331 = vmatmul.msk.f32.gmra.mxu2 %vm277_vm2, %v622_v18 }
 0x173   : > { %1355 = vmatmul.msk.f32.gmra.mxu0 %vm277_vm2, %v1732_v36  ;;  %1362 = vmatmul.msk.f32.gmra.mxu1 %vm277_vm2, %v392_v23  ;;  %v542_v51 = vld [vmem:[#allocation2 + $0x62] sm:$0xff] }
 0x179   : > { %v362_v37 = vpop.trf.xlu0  ;;  %v396_v38 = vld [vmem:[#allocation2 + $0x71] sm:$0xff] }
 0x17a   : > { %v1740_v39 = vld [vmem:[#allocation2 + $0x70] sm:$0xff]  ;;  %379 = vst.msk [vmem:[#allocation2 + $0x81] sm:$0xff] %vm277_vm2, %v362_v37  ;;  %1328 = vmatmul.msk.f32.gmra.mxu3 %vm277_vm2, %v396_v38  ;;  %1332 = vmatmul.msk.f32.gmra.mxu2 %vm277_vm2, %v1695_v21 }
 0x17b   : > { %1356 = vmatmul.msk.f32.gmra.mxu0 %vm277_vm2, %v1740_v39  ;;  %1363 = vmatmul.msk.f32.gmra.mxu1 %vm277_vm2, %v393_v27  ;;  %v543_v52 = vld [vmem:[#allocation2 + $0x72] sm:$0xff] }
 0x181   : > { %v1757_v43 = vld [vmem:[#allocation2 + $0x80] sm:$0xff] }
 0x182   : > { %1333 = vmatmul.msk.f32.gmra.mxu2 %vm277_vm2, %v1702_v24  ;;  %1340 = vmatmul.msk.f32.vlgmr.msrb.gmra.mxu3 %vm277_vm2, %v536_v42  ;;  %v715_v47 = vld [vmem:[#allocation2 + $0x81] sm:$0xff] }
 0x183   : > { %1357 = vmatmul.msk.f32.gmra.mxu0 %vm277_vm2, %v1757_v43  ;;  %1364 = vmatmul.msk.f32.gmra.mxu1 %vm277_vm2, %v394_v32  ;;  %v1059_v54 = vld [vmem:[#allocation2 + $0x82] sm:$0xff] }
 0x18a   : > { %1334 = vmatmul.msk.f32.gmra.mxu2 %vm277_vm2, %v1712_v28  ;;  %1341 = vmatmul.msk.f32.gmra.mxu3 %vm277_vm2, %v537_v45 }
 0x18b   : > { %1365 = vmatmul.msk.f32.gmra.mxu1 %vm277_vm2, %v395_v35  ;;  %1390 = vmatmul.msk.f32.vlgmr.msrb.gmra.mxu0 %vm277_vm2, %v1693_v20 }
 0x192   : > { %1335 = vmatmul.msk.f32.gmra.mxu2 %vm277_vm2, %v1723_v33  ;;  %1342 = vmatmul.msk.f32.gmra.mxu3 %vm277_vm2, %v538_v46 }
 0x193   : > { %1366 = vmatmul.msk.f32.gmra.mxu1 %vm277_vm2, %v396_v38  ;;  %1391 = vmatmul.msk.f32.gmra.mxu0 %vm277_vm2, %v392_v23 }
 0x19a   : > { %1336 = vmatmul.msk.f32.gmra.mxu2 %vm277_vm2, %v1732_v36  ;;  %1343 = vmatmul.msk.f32.gmra.mxu3 %vm277_vm2, %v539_v48 }
 0x19b   : > { %1367 = vmatmul.msk.f32.gmra.mxu1 %vm277_vm2, %v715_v47  ;;  %1392 = vmatmul.msk.f32.gmra.mxu0 %vm277_vm2, %v393_v27 }
 0x1a2   : > { %1337 = vmatmul.msk.f32.gmra.mxu2 %vm277_vm2, %v1740_v39  ;;  %1344 = vmatmul.msk.f32.gmra.mxu3 %vm277_vm2, %v540_v49 }
 0x1a3   : > { %1393 = vmatmul.msk.f32.gmra.mxu0 %vm277_vm2, %v394_v32  ;;  %1400 = vmatmul.msk.f32.vlgmr.msra.gmra.mxu1 %vm277_vm2, %v538_v46 }
 0x1aa   : > { %1345 = vmatmul.msk.f32.gmra.mxu3 %vm277_vm2, %v541_v50  ;;  %1370 = vmatmul.msk.f32.vlgmr.msra.gmra.mxu2 %vm277_vm2, %v537_v45 }
 0x1ab   : > { %1394 = vmatmul.msk.f32.gmra.mxu0 %vm277_vm2, %v395_v35  ;;  %1401 = vmatmul.msk.f32.gmra.mxu1 %vm277_vm2, %v539_v48 }
 0x1b2   : > { %1346 = vmatmul.msk.f32.gmra.mxu3 %vm277_vm2, %v542_v51  ;;  %1371 = vmatmul.msk.f32.gmra.mxu2 %vm277_vm2, %v538_v46 }
 0x1b3   : > { %1395 = vmatmul.msk.f32.gmra.mxu0 %vm277_vm2, %v396_v38  ;;  %1402 = vmatmul.msk.f32.gmra.mxu1 %vm277_vm2, %v540_v49 }
 0x1ba   : > { %1347 = vmatmul.msk.f32.gmra.mxu3 %vm277_vm2, %v543_v52  ;;  %1372 = vmatmul.msk.f32.gmra.mxu2 %vm277_vm2, %v539_v48 }
 0x1bb   : > { %1403 = vmatmul.msk.f32.gmra.mxu1 %vm277_vm2, %v541_v50  ;;  %1396 = vmatmul.msk.f32.gmra.mxu0 %vm277_vm2, %v715_v47 }
 0x1c2   : > { %1373 = vmatmul.msk.f32.gmra.mxu2 %vm277_vm2, %v540_v49  ;;  %1380 = vmatmul.msk.f32.vlgmr.msra.gmra.mxu3 %vm277_vm2, %v1695_v21 }
 0x1c3   : > { %1404 = vmatmul.msk.f32.gmra.mxu1 %vm277_vm2, %v542_v51  ;;  %1397 = vmatmul.msk.f32.gmra.mxu0 %vm277_vm2, %v974_v58 }
 0x1c7   : > { %v447_v53 = vpop.f32.mrf.mxu1 }
 0x1c8   : > { %v676_v61 = vpop.f32.mrf.mxu0 }
 0x1ca   : > { %1374 = vmatmul.msk.f32.gmra.mxu2 %vm277_vm2, %v541_v50  ;;  %1381 = vmatmul.msk.f32.gmra.mxu3 %vm277_vm2, %v1702_v24 }
 0x1cb   : > { %1405 = vmatmul.msk.f32.gmra.mxu1 %vm277_vm2, %v543_v52 }
 0x1cf   : > { %v450_v55 = vpop.f32.mrf.mxu1 }
 0x1d0   : > { %v679_v4 = vpop.f32.mrf.mxu0 }
 0x1d2   : > { %1375 = vmatmul.msk.f32.gmra.mxu2 %vm277_vm2, %v542_v51  ;;  %1382 = vmatmul.msk.f32.gmra.mxu3 %vm277_vm2, %v1712_v28 }
 0x1d3   : > { %1406 = vmatmul.msk.f32.gmra.mxu1 %vm277_vm2, %v1059_v54 }
 0x1d7   : > { %v453_v57 = vpop.f32.mrf.mxu1 }
 0x1d8   : > { %v682_v12 = vpop.f32.mrf.mxu0 }
 0x1da   : > { %1376 = vmatmul.msk.f32.gmra.mxu2 %vm277_vm2, %v543_v52  ;;  %1383 = vmatmul.msk.f32.gmra.mxu3 %vm277_vm2, %v1723_v33 }
 0x1db   : > { %1407 = vmatmul.msk.f32.gmra.mxu1 %vm277_vm2, %v1060_v59 }
 0x1df   : > { %v762_v62 = vpop.f32.mrf.mxu1 }
 0x1e0   : > { %v685_v19 = vpop.f32.mrf.mxu0 }
 0x1e2   : > { %1377 = vmatmul.msk.f32.gmra.mxu2 %vm277_vm2, %v1059_v54  ;;  %1384 = vmatmul.msk.f32.gmra.mxu3 %vm277_vm2, %v1732_v36 }
 0x1e5   : > { %v456_v60 = vpop.f32.mrf.mxu2 }
 0x1e8   : > { %v765_v5 = vpop.f32.mrf.mxu1  ;;  %v688_v28 = vpop.f32.mrf.mxu0 }
 0x1ea   : > { %1385 = vmatmul.msk.f32.gmra.mxu3 %vm277_vm2, %v1740_v39 }
 0x1ed   : > { %v459_v63 = vpop.f32.mrf.mxu3  ;;  %v512_v0 = vpop.f32.mrf.mxu2 }
 0x1ee   : > { %v513_v1 = vadd.f32 %v512_v0, %v444_v56 }
 0x1f0   : > { %v768_v13 = vpop.f32.mrf.mxu1  ;;  %v691_v37 = vpop.f32.mrf.mxu0 }
 0x1f2   : > { %1386 = vmatmul.msk.f32.gmra.mxu3 %vm277_vm2, %v1757_v43 }
 0x1f5   : > { %v462_v6 = vpop.f32.mrf.mxu3  ;;  %v515_v7 = vpop.f32.mrf.mxu2 }
 0x1f6   : > { %v516_v8 = vadd.f32 %v515_v7, %v447_v53 }
 0x1f8   : > { %v771_v20 = vpop.f32.mrf.mxu1  ;;  %v694_v47 = vpop.f32.mrf.mxu0 }
 0x1fa   : > { %1387 = vmatmul.msk.f32.gmra.mxu3 %vm277_vm2, %v888_v9 }
 0x1fd   : > { %v1827_v10 = vpop.f32.mrf.mxu3  ;;  %v518_v11 = vpop.f32.mrf.mxu2 }
 0x1fe   : > { %v519_v14 = vadd.f32 %v518_v11, %v450_v55 }
 0x200   : > { %v774_v29 = vpop.f32.mrf.mxu1  ;;  %v697_v56 = vpop.f32.mrf.mxu0 }
 0x205   : > { %v521_v15 = vpop.f32.mrf.mxu2  ;;  %v590_v16 = vpop.f32.mrf.mxu3 }
 0x206   : > { %v522_v17 = vadd.f32 %v521_v15, %v453_v57  ;;  %v614_v18 = vadd.f32 %v590_v16, %v513_v1 }
 0x208   : > { %v700_v21 = vadd.f32 %v676_v61, %v614_v18  ;;  %v777_v38 = vpop.f32.mrf.mxu1  ;;  %v1021_v1 = vpop.f32.mrf.mxu0 }
 0x20a   : > { %v786_v22 = vadd.f32 %v762_v62, %v700_v21 }
 0x20d   : > { %v524_v23 = vpop.f32.mrf.mxu2  ;;  %v593_v24 = vpop.f32.mrf.mxu3 }
 0x20e   : > { %v525_v25 = vadd.f32 %v524_v23, %v456_v60  ;;  %v615_v26 = vadd.f32 %v593_v24, %v516_v8 }
 0x210   : > { %v701_v27 = vadd.f32 %v679_v4, %v615_v26  ;;  %v780_v49 = vpop.f32.mrf.mxu1  ;;  %v1024_v7 = vpop.f32.mrf.mxu0 }
 0x212   : > { %v787_v30 = vadd.f32 %v765_v5, %v701_v27 }
 0x215   : > { %v527_v31 = vpop.f32.mrf.mxu2  ;;  %v596_v32 = vpop.f32.mrf.mxu3 }
 0x216   : > { %v528_v33 = vadd.f32 %v527_v31, %v459_v63  ;;  %v616_v34 = vadd.f32 %v596_v32, %v519_v14 }
 0x218   : > { %v702_v35 = vadd.f32 %v682_v12, %v616_v34  ;;  %v783_v58 = vpop.f32.mrf.mxu1  ;;  %v1027_v16 = vpop.f32.mrf.mxu0 }
 0x21a   : > { %v1829_v36 = vadd.f32 %v768_v13, %v702_v35 }
 0x21d   : > { %v530_v39 = vpop.f32.mrf.mxu2  ;;  %v599_v40 = vpop.f32.mrf.mxu3 }
 0x21e   : > { %v531_v41 = vadd.f32 %v530_v39, %v462_v6  ;;  %v617_v42 = vadd.f32 %v599_v40, %v522_v17 }
 0x220   : > { %v703_v43 = vadd.f32 %v685_v19, %v617_v42  ;;  %v1107_v5 = vpop.f32.mrf.mxu1  ;;  %v1030_v23 = vpop.f32.mrf.mxu0 }
 0x222   : > { %v1831_v44 = vadd.f32 %v771_v20, %v703_v43 }
 0x225   : > { %v533_v45 = vpop.f32.mrf.mxu2  ;;  %v602_v46 = vpop.f32.mrf.mxu3 }
 0x226   : > { %v618_v48 = vadd.f32 %v602_v46, %v525_v25  ;;  %v534_v35 = vadd.f32 %v533_v45, %v1827_v10  ;;  %v1473_v45 = vld [vmem:[%s1911_s4] ss:$0 sm:$0xff] }
 0x228   : > { %v704_v50 = vadd.f32 %v688_v28, %v618_v48  ;;  %v1110_v8 = vpop.f32.mrf.mxu1  ;;  %v1033_v27 = vpop.f32.mrf.mxu0 }
 0x22a   : > { %v1833_v51 = vadd.f32 %v774_v29, %v704_v50 }
 0x22d   : > { %v605_v52 = vpop.f32.mrf.mxu3  ;;  %v848_v53 = vpop.f32.mrf.mxu2 }
 0x22e   : > { %v619_v54 = vadd.f32 %v605_v52, %v528_v33  ;;  %v872_v55 = vadd.f32 %v848_v53, %v786_v22 }
 0x230   : > { %v705_v57 = vadd.f32 %v691_v37, %v619_v54  ;;  %v1837_v18 = vpop.f32.mrf.mxu1  ;;  %v1036_v31 = vpop.f32.mrf.mxu0 }
 0x232   : > { %v791_v59 = vadd.f32 %v777_v38, %v705_v57 }
 0x235   : > { %v608_v60 = vpop.f32.mrf.mxu3  ;;  %v851_v61 = vpop.f32.mrf.mxu2 }
 0x236   : > { %v620_v62 = vadd.f32 %v608_v60, %v531_v41  ;;  %v873_v63 = vadd.f32 %v851_v61, %v787_v30 }
 0x238   : > { %v706_v0 = vadd.f32 %v694_v47, %v620_v62  ;;  %v1116_v24 = vpop.f32.mrf.mxu1  ;;  %v1039_v38 = vpop.f32.mrf.mxu0 }
 0x23a   : > { %v792_v4 = vadd.f32 %v780_v49, %v706_v0 }
 0x23d   : > { %v611_v6 = vpop.f32.mrf.mxu3  ;;  %v854_v12 = vpop.f32.mrf.mxu2 }
 0x23e   : > { %v621_v37 = vadd.f32 %v611_v6, %v534_v35 }
 0x240   : > { %v1119_v28 = vpop.f32.mrf.mxu1  ;;  %v707_v40 = vadd.f32 %v697_v56, %v621_v37  ;;  %v1042_v52 = vpop.f32.mrf.mxu0 }
 0x242   : > { %v793_v46 = vadd.f32 %v783_v58, %v707_v40 }
 0x245   : > { %v935_v9 = vpop.f32.mrf.mxu3  ;;  %v857_v20 = vpop.f32.mrf.mxu2 }
 0x246   : > { %v959_v11 = vadd.f32 %v935_v9, %v872_v55 }
 0x248   : > { %v1045_v13 = vadd.f32 %v1021_v1, %v959_v11  ;;  %v1122_v32 = vpop.f32.mrf.mxu1 }
 0x24a   : > { %v1835_v14 = vadd.f32 %v1107_v5, %v1045_v13 }
 0x24d   : > { %v938_v15 = vpop.f32.mrf.mxu3  ;;  %v860_v25 = vpop.f32.mrf.mxu2 }
 0x24e   : > { %v960_v17 = vadd.f32 %v938_v15, %v873_v63  ;;  %v876_v60 = vadd.f32 %v860_v25, %v1833_v51 }
 0x250   : > { %v1046_v19 = vadd.f32 %v1024_v7, %v960_v17  ;;  %v1125_v41 = vpop.f32.mrf.mxu1  ;;  %v874_v7 = vadd.f32 %v854_v12, %v1829_v36 }
 0x252   : > { %v1839_v21 = vadd.f32 %v1110_v8, %v1046_v19 }
 0x254   : > { %v1144_v25 = vadd.f32 %v1473_v45, %v1839_v21  ;;  %v1160_v21 = vld [vmem:[%s1912_s5 + $0x8] sm:$0xff] }
 0x255   : > { %v941_v22 = vpop.f32.mrf.mxu3  ;;  %v863_v29 = vpop.f32.mrf.mxu2 }
 0x256   : > { %v877_v48 = vadd.f32 %v863_v29, %v791_v59  ;;  %v875_v59 = vadd.f32 %v857_v20, %v1831_v44  ;;  %v961_v51 = vadd.f32 %v941_v22, %v874_v7  ;;  %v1161_v20 = vld [vmem:[%s1913_s6] sm:$0xff] }
 0x257   : > { %1165 = vperm.xlu1 %1472, %v1161_v20   ;;  %v1159_v29 = vld [vmem:[%s1912_s5] sm:$0xff] }
 0x258   : > { %v1128_v57 = vpop.f32.mrf.mxu1  ;;  %v1047_v15 = vadd.f32 %v1027_v16, %v961_v51  ;;  %v1162_v16 = vld [vmem:[%s1913_s6 + $0x8] sm:$0xff] }
 0x25a   : > { %v1133_v36 = vadd.f32 %v1837_v18, %v1047_v15  ;;  %v1143_v18 = vadd.f32 %v1473_v45, %v1835_v14 }
 0x25d   : > { %v944_v26 = vpop.f32.mrf.mxu3  ;;  %v866_v34 = vpop.f32.mrf.mxu2 }
 0x25e   : > { %v878_v42 = vadd.f32 %v866_v34, %v792_v4  ;;  %v962_v0 = vadd.f32 %v944_v26, %v875_v59 }
 0x25f   : > { %1170 = vperm.xlu1 %1472, %v1162_v16  }
 0x260   : > { %v1048_v8 = vadd.f32 %v1030_v23, %v962_v0  ;;  %v1145_v23 = vadd.f32 %v1473_v45, %v1133_v36 }
 0x262   : > { %v1134_v17 = vadd.f32 %v1116_v24, %v1048_v8  ;;  %v1153_v26 = vmax.f32 %v1145_v23, 0.0 }
 0x264   : > { %v1146_v12 = vadd.f32 %v1473_v45, %v1134_v17 }
 0x265   : > { %v947_v30 = vpop.f32.mrf.mxu3  ;;  %v869_v43 = vpop.f32.mrf.mxu2 }
 0x266   : > { %v879_v49 = vadd.f32 %v869_v43, %v793_v46  ;;  %v963_v56 = vadd.f32 %v947_v30, %v876_v60  ;;  %v1154_v24 = vmax.f32 %v1146_v12, 0.0 }
 0x268   : > { %v1049_v1 = vadd.f32 %v1033_v27, %v963_v56  ;;  %v1152_v27 = vmax.f32 %v1144_v25, 0.0 }
 0x26a   : > { %v1135_v9 = vadd.f32 %v1119_v28, %v1049_v1  ;;  %v1151_v28 = vmax.f32 %v1143_v18, 0.0 }
 0x26c   : > { %v1147_v44 = vadd.f32 %v1473_v45, %v1135_v9 }
 0x26d   : > { %v950_v33 = vpop.f32.mrf.mxu3 }
 0x26e   : > { %v964_v53 = vadd.f32 %v950_v33, %v877_v48  ;;  %v1155_v22 = vmax.f32 %v1147_v44, 0.0 }
 0x270   : > { %v1050_v61 = vadd.f32 %v1036_v31, %v964_v53 }
 0x272   : > { %v1136_v4 = vadd.f32 %v1122_v32, %v1050_v61 }
 0x274   : > { %v1148_v11 = vadd.f32 %v1473_v45, %v1136_v4 }
 0x275   : > { %v953_v39 = vpop.f32.mrf.mxu3 }
 0x276   : > { %v965_v47 = vadd.f32 %v953_v39, %v878_v42  ;;  %v1156_v19 = vmax.f32 %v1148_v11, 0.0 }
 0x278   : > { %v1051_v54 = vadd.f32 %v1039_v38, %v965_v47 }
 0x27a   : > { %v1137_v62 = vadd.f32 %v1125_v41, %v1051_v54 }
 0x27c   : > { %v1149_v5 = vadd.f32 %v1473_v45, %v1137_v62 }
 0x27d   : > { %v956_v50 = vpop.f32.mrf.mxu3 }
 0x27e   : > { %v966_v55 = vadd.f32 %v956_v50, %v879_v49  ;;  %v1157_v13 = vmax.f32 %v1149_v5, 0.0 }
 0x280   : > { %v1052_v10 = vadd.f32 %v1042_v52, %v966_v55 }
 0x282   : > { %v1138_v58 = vadd.f32 %v1128_v57, %v1052_v10 }
 0x284   : > { %v1150_v63 = vadd.f32 %v1473_v45, %v1138_v58 }
 0x286   : > { %v1158_v6 = vmax.f32 %v1150_v63, 0.0 }
 0x288   : > { %1408 = vmatpush.xpose.msk.msrb.mxu2 %vm277_vm2, %v1158_v6 }
 0x28c   : > { %1409 = vmatpush.xpose.msk.msrb.mxu2 %vm277_vm2, %v1157_v13 }
 0x290   : > { %1410 = vmatpush.xpose.msk.msrb.mxu2 %vm277_vm2, %v1156_v19 }
 0x294   : > { %1411 = vmatpush.xpose.msk.msrb.mxu2 %vm277_vm2, %v1155_v22 }
 0x298   : > { %1412 = vmatpush.xpose.msk.msrb.mxu2 %vm277_vm2, %v1154_v24 }
 0x29c   : > { %1413 = vmatpush.xpose.msk.msrb.mxu2 %vm277_vm2, %v1153_v26 }
 0x2a0   : > { %1414 = vmatpush.xpose.msk.msrb.mxu2 %vm277_vm2, %v1152_v27 }
 0x2a4   : > { %1415 = vmatpush.xpose.msk.msrb.mxu2 %vm277_vm2, %v1151_v28 }
 0x2a7   : > { %1416 = vmatmul.msk.f32.vlgmr.msrb.gmra.mxu2 %vm277_vm2, %v1159_v29 }
 0x2af   : > { %1417 = vmatmul.msk.f32.gmra.mxu2 %vm277_vm2, %v1160_v21 }
 0x2c9   : > { %v1166_v30 = vpop.permute.xlu1 %1165 }
 0x2d1   : > { %v1171_v34 = vpop.permute.xlu1 %1170 }
 0x32a   : > { %v1220_v14 = vpop.f32.mrf.mxu2 }
 0x32b   : > { %v1221_v31 = vadd.f32 %v1220_v14, %v1166_v30 }
 0x32d   : > { %v1226_v32 = vadd.f32 %v1221_v31, %v1640_v3 }
 0x32f   : > { %v1228_v33 = vmax.f32 %v1226_v32, 0.0 }
 0x331   : > { %1231 = vst.msk [vmem:[%s271_s14] sm:$0xff] %vm1230_vm5, %v1228_v33 }
 0x332   : > { %v1223_v35 = vpop.f32.mrf.mxu2 }
 0x333   : > { %v1224_v37 = vadd.f32 %v1223_v35, %v1171_v34 }
 0x335   : > { %v1227_v38 = vadd.f32 %v1224_v37, %v1638_v2 }
 0x337   : > { %v1229_v3 = vmax.f32 %v1227_v38, 0.0 }
 0x339   : > { %1232 = vst.msk [vmem:[%s271_s14 + $0x8] sm:$0xff] %vm1230_vm5, %v1229_v3 }
 0x33a   : > { %1501 = shalt.err (!%p1498_p3)
}
 0x33b   : > { %s1540_s22 = smov 128   ;;  %s1541_s8 = smov 8  }
 0x33c   : > { %1428 = dma.vmem_to_hbm [thread:$0]  (%p1620_p5), %s1247_s15, 256, %s1249_s16, %s1234_s28, %s1540_s22, %s1540_s22, %s1541_s8  }
 0x33d PF: > { %p1434_p4 = scmp.ge.s32.totalorder %s1536_s27, 2  ;;  %s1263_s9 = sand.u32 1, %s1524_s24  }
 0x33e   : > { %s1264_s13 = scalar_lea.sflag [#allocation4], %s1263_s9 }
 0x33f   : > { %p1431_p7 = pnand %p1434_p4, %p1624_p6 }
 0x341   : > { %p1432_p8 = pneg %p1431_p7 }
 0x343   : > { %1519 = dma.done.wait (%p1432_p8), %s1264_s13, 256  }
 0x344   : > { %1521 = vsyncadd (%p1432_p8), %s1264_s13, 4294967040  ;;  %p17_p9 = scmp.ge.s32.totalorder %s1607_s30, 4   ;;  %s1917_s24 = smov %s1528_s25 }
 0x345   : > { %s1918_s25 = smov %s1532_s26  ;;  %s1919_s26 = smov %s1618_s10 }
 0x346   : > { %s1920_s27 = smov %s1607_s30  ;;  %19 = sbr.rel (!%p17_p9) target bundleno = 3 (0x3), region = 94 }
 0x34b   :  { %1270 = vsyncpa [#allocation4], 1 }
 0x34c   :  { %1272 = vsyncpa [#allocation4 + $0x1], 1 }

</bundles_post_ra>
